<compile_context>
chip_gen: v6e
topology: v6e:2x2x1
jax: 0.10.0
libtpu: 0.0.40
codegen_flags: <defaults>
</compile_context>

<pallas_src>
import functools

import jax
import jax.numpy as jnp
from jax.experimental import pallas as pl
from jax.experimental.pallas import tpu as pltpu


def _round_up(x, m):
    return (x + m - 1) // m * m


def _vmem_capacity_bytes():
    try:
        return int(pltpu.get_tpu_info().vmem_capacity_bytes)
    except Exception:
        return 64 << 20  # conservative default (v7x per-TC VMEM)


def _choose_tb(B, row_bytes, block_budget):
    """Sublane-aligned batch tile, VMEM-capped, >= 2 grid steps when B allows."""
    cap = max(8, (block_budget // max(row_bytes, 1)) // 8 * 8)
    tb = min(_round_up(B, 8), cap)
    if B >= 16:
        # Keep at least two grid steps so megacore / v7x's 2 TensorCores both
        # get work under dimension_semantics=("parallel",).
        tb = min(tb, _round_up(pl.cdiv(B, 2), 8))
    if tb >= B:
        tb = B  # single full block (also covers B < 8; full-dim block is legal)
    return tb


def _attn_kernel_flat(gate_ref, expert_ref, wrep_ref, seg_ref, out_ref, *, scale):
    # gate_ref   : (TB, H)     hidden_gate tile, native dtype
    # expert_ref : (TB, E*H)   lane-dense hidden_expert tile, native dtype
    # wrep_ref   : (H, E*H)    (Wq^T @ Wk) tiled E times along lanes, f32
    # seg_ref    : (E*H, E)    one-hot segment-sum matrix, f32
    # out_ref    : (TB, E)     softmax over the expert axis
    #
    # t_rep[b, e*H + h] = sum_k gate[b, k] * W[k, h]   (same for every expert e)
    t_rep = jax.lax.dot_general(
        gate_ref[...], wrep_ref[...], (((1,), (0,)), ((), ())),
        preferred_element_type=jnp.float32)                       # (TB, E*H)
    # Elementwise product with the native-dtype expert slab (promotes to f32
    # inside the multiply; no eager full-block astype).
    prod = t_rep * expert_ref[...]                                # (TB, E*H)
    # Per-expert H-wide segment reduction on the MXU: (TB, E*H) @ (E*H, E).
    s = jax.lax.dot_general(
        prod, seg_ref[...], (((1,), (0,)), ((), ())),
        preferred_element_type=jnp.float32) * scale               # (TB, E)
    m = jnp.max(s, axis=-1, keepdims=True)
    p = jnp.exp(s - m)
    inv = pl.reciprocal(jnp.sum(p, axis=-1, keepdims=True), approx=True)
    out_ref[...] = (p * inv).astype(out_ref.dtype)


def _attn_kernel_3d(gate_ref, expert_ref, w_ref, out_ref, *, scale):
    # Fallback for H >= 128 (no lane-padding waste in the (TB, E, H) block).
    # gate_ref: (TB, H), expert_ref: (TB, E, H), w_ref: (H, H) = Wq^T @ Wk
    t = jax.lax.dot_general(
        gate_ref[...], w_ref[...], (((1,), (0,)), ((), ())),
        preferred_element_type=jnp.float32)                       # (TB, H)
    s = jnp.sum(t[:, None, :] * expert_ref[...], axis=-1) * scale  # (TB, E)
    m = jnp.max(s, axis=-1, keepdims=True)
    p = jnp.exp(s - m)
    inv = pl.reciprocal(jnp.sum(p, axis=-1, keepdims=True), approx=True)
    out_ref[...] = (p * inv).astype(out_ref.dtype)


@jax.jit
def attention_forward(hidden_expert, hidden_gate, wq, wk):
    """hidden_expert: (B, E, H), hidden_gate: (B, H), wq/wk: (H, H) (out, in)."""
    B, E, H = hidden_expert.shape
    assert hidden_gate.shape == (B, H)
    scale = 1.0 / float(H) ** 0.5

    hp = jax.lax.Precision.HIGHEST
    # Fold the two nn.Linear weights (stored (out, in)) into one matrix:
    #   score = (Wq g)^T (Wk x) = g^T (Wq^T Wk) x
    w = jnp.dot(wq.T.astype(jnp.float32), wk.astype(jnp.float32), precision=hp)

    phys_vmem = _vmem_capacity_bytes()
    block_budget = (4 << 20) if phys_vmem <= (64 << 20) else (8 << 20)
    vmem_limit = int(min(64 << 20, max(32 << 20, phys_vmem // 2)))

    itemsize = jnp.dtype(hidden_expert.dtype).itemsize
    row_bytes = E * H * itemsize
    TB = _choose_tb(B, row_bytes, block_budget)
    grid = (pl.cdiv(B, TB),)
    params = pltpu.CompilerParams(
        dimension_semantics=("parallel",), vmem_limit_bytes=vmem_limit)

    use_flat = (H < 128) and (E * H <= 4096)
    if use_flat:
        EH = E * H
        expert_flat = hidden_expert.reshape(B, EH)   # contiguous, no data movement
        w_rep = jnp.tile(w, (1, E))                  # (H, E*H), f32, tiny constant
        seg = (jax.lax.broadcasted_iota(jnp.int32, (EH, E), 0) // H ==
               jax.lax.broadcasted_iota(jnp.int32, (EH, E), 1)
               ).astype(jnp.float32)                 # (E*H, E) one-hot segments
        kernel = functools.partial(_attn_kernel_flat, scale=scale)
        out = pl.pallas_call(
            kernel,
            out_shape=jax.ShapeDtypeStruct((B, E), jnp.float32),
            grid_spec=pltpu.PrefetchScalarGridSpec(
                num_scalar_prefetch=0,
                grid=grid,
                in_specs=[
                    pl.BlockSpec((TB, H), lambda i: (i, 0)),    # hidden_gate
                    pl.BlockSpec((TB, EH), lambda i: (i, 0)),   # hidden_expert flat
                    pl.BlockSpec((H, EH), lambda i: (0, 0)),    # W tiled per expert
                    pl.BlockSpec((EH, E), lambda i: (0, 0)),    # segment-sum matrix
                ],
                out_specs=pl.BlockSpec((TB, E), lambda i: (i, 0)),
            ),
            compiler_params=params,
        )(hidden_gate, expert_flat, w_rep, seg)
    else:
        # TODO(synk): tile the expert axis (two-pass / online softmax over E)
        # when a single batch row's (E, H) slab exceeds the per-block VMEM budget.
        kernel = functools.partial(_attn_kernel_3d, scale=scale)
        out = pl.pallas_call(
            kernel,
            out_shape=jax.ShapeDtypeStruct((B, E), jnp.float32),
            grid_spec=pltpu.PrefetchScalarGridSpec(
                num_scalar_prefetch=0,
                grid=grid,
                in_specs=[
                    pl.BlockSpec((TB, H), lambda i: (i, 0)),        # hidden_gate
                    pl.BlockSpec((TB, E, H), lambda i: (i, 0, 0)),  # hidden_expert
                    pl.BlockSpec((H, H), lambda i: (0, 0)),         # folded W
                ],
                out_specs=pl.BlockSpec((TB, E), lambda i: (i, 0)),
            ),
            compiler_params=params,
        )(hidden_gate, hidden_expert, w)

    return out


def _reference(hidden_expert, hidden_gate, wq, wk):
    # Pure-JAX mirror of the PyTorch forward (HIGHEST precision f32 matmuls).
    H = hidden_gate.shape[-1]
    hp = jax.lax.Precision.HIGHEST
    q = jnp.dot(hidden_gate, wq.T, precision=hp)                     # (B, H)
    k = jnp.einsum('beh,oh->beo', hidden_expert, wk, precision=hp)   # (B, E, H)
    s = jnp.einsum('bh,beh->be', q, k, precision=hp) / float(H) ** 0.5
    return jax.nn.softmax(s, axis=1)


if __name__ == "__main__":
    key = jax.random.PRNGKey(0)
    kg, ke, kq, kk = jax.random.split(key, 4)

    B, E, H = 8, 4, 32  # batch, experts, hidden
    hidden_gate = jax.random.normal(kg, (B, H), dtype=jnp.float32)
    hidden_expert = jax.random.normal(ke, (B, E, H), dtype=jnp.float32)
    # nn.Linear-like init scale keeps alignment scores O(1)
    wq = jax.random.normal(kq, (H, H), dtype=jnp.float32) / float(H) ** 0.5
    wk = jax.random.normal(kk, (H, H), dtype=jnp.float32) / float(H) ** 0.5

    attn = attention_forward(hidden_expert, hidden_gate, wq, wk)
    jax.block_until_ready(attn)

    ref = _reference(hidden_expert, hidden_gate, wq, wk)
    assert attn.shape == (B, E), attn.shape
    # approx reciprocal (EUP) in the softmax epilogue -> slightly looser tol
    assert jnp.allclose(attn, ref, atol=2e-3, rtol=2e-3), (attn, ref)
    print("KERNEL_OK")
</pallas_src>

<mosaic_0001>
module attributes {stable_mosaic.version = 11 : i64} {
  func.func @_attn_kernel_flat(%arg0: i32, %arg1: memref<8x32xf32, #tpu.memory_space<vmem>>, %arg2: memref<8x128xf32, #tpu.memory_space<vmem>>, %arg3: memref<32x128xf32, #tpu.memory_space<vmem>>, %arg4: memref<128x4xf32, #tpu.memory_space<vmem>>, %arg5: memref<8x4xf32, #tpu.memory_space<vmem>>) attributes {dimension_semantics = [#tpu.dimension_semantics<parallel>], iteration_bounds = array<i64: 1>, scalar_prefetch = 0 : i64, scratch_operands = 0 : i64, tpu.core_type = #tpu.core_type<tc>, window_params = [{transform_indices = @transform_0, window_bounds = array<i64: 8, 32>}, {transform_indices = @transform_1, window_bounds = array<i64: 8, 128>}, {pipeline_mode = #tpu.pipeline_mode<synchronous>, transform_indices = @transform_2, window_bounds = array<i64: 32, 128>}, {pipeline_mode = #tpu.pipeline_mode<synchronous>, transform_indices = @transform_3, window_bounds = array<i64: 128, 4>}, {transform_indices = @transform_4, window_bounds = array<i64: 8, 4>}]} {
    %c0 = arith.constant 0 : index
    %c0_0 = arith.constant 0 : index
    %0 = vector.load %arg1[%c0, %c0_0] : memref<8x32xf32, #tpu.memory_space<vmem>>, vector<8x32xf32>
    %c0_1 = arith.constant 0 : index
    %c0_2 = arith.constant 0 : index
    %1 = vector.load %arg3[%c0_1, %c0_2] : memref<32x128xf32, #tpu.memory_space<vmem>>, vector<32x128xf32>
    %cst = arith.constant dense<0.000000e+00> : vector<8x128xf32>
    %2 = tpu.matmul %0, %1, %cst {dimension_numbers = #tpu.dot_dimension_numbers<[1], [0], [0], [1], [0, 0, 1, 1], [], []>} : vector<8x32xf32>, vector<32x128xf32>, vector<8x128xf32> -> vector<8x128xf32>
    %c0_3 = arith.constant 0 : index
    %c0_4 = arith.constant 0 : index
    %3 = vector.load %arg2[%c0_3, %c0_4] : memref<8x128xf32, #tpu.memory_space<vmem>>, vector<8x128xf32>
    %4 = arith.mulf %2, %3 : vector<8x128xf32>
    %c0_5 = arith.constant 0 : index
    %c0_6 = arith.constant 0 : index
    %5 = vector.load %arg4[%c0_5, %c0_6] : memref<128x4xf32, #tpu.memory_space<vmem>>, vector<128x4xf32>
    %cst_7 = arith.constant dense<0.000000e+00> : vector<8x4xf32>
    %6 = tpu.matmul %4, %5, %cst_7 {dimension_numbers = #tpu.dot_dimension_numbers<[1], [0], [0], [1], [0, 0, 1, 1], [], []>} : vector<8x128xf32>, vector<128x4xf32>, vector<8x4xf32> -> vector<8x4xf32>
    %cst_8 = arith.constant 0.176776692 : f32
    %7 = vector.broadcast %cst_8 : f32 to vector<8x4xf32>
    %8 = arith.mulf %6, %7 : vector<8x4xf32>
    %cst_9 = arith.constant dense<0xFF800000> : vector<8xf32>
    %9 = vector.multi_reduction <maximumf>, %8, %cst_9 [1] : vector<8x4xf32> to vector<8xf32>
    %10 = vector.shape_cast %9 : vector<8xf32> to vector<8x1xf32>
    %11 = vector.broadcast %10 : vector<8x1xf32> to vector<8x4xf32>
    %12 = arith.subf %8, %11 : vector<8x4xf32>
    %13 = math.exp %12 : vector<8x4xf32>
    %cst_10 = arith.constant dense<0.000000e+00> : vector<8xf32>
    %14 = vector.multi_reduction <add>, %13, %cst_10 [1] : vector<8x4xf32> to vector<8xf32>
    %15 = vector.shape_cast %14 : vector<8xf32> to vector<8x1xf32>
    %16 = tpu.reciprocal %15 {approx = true} : vector<8x1xf32> -> vector<8x1xf32>
    %17 = vector.broadcast %16 : vector<8x1xf32> to vector<8x4xf32>
    %18 = arith.mulf %13, %17 : vector<8x4xf32>
    %c0_11 = arith.constant 0 : index
    %c0_12 = arith.constant 0 : index
    %19 = vector.load %arg5[%c0_11, %c0_12] : memref<8x4xf32, #tpu.memory_space<vmem>>, vector<8x4xf32>
    tpu.vector_store %arg5[%c0_11, %c0_12], %18 {strides = array<i32>} : memref<8x4xf32, #tpu.memory_space<vmem>>, vector<8x4xf32>,
    return
  }
  func.func @transform_0(%arg0: i32) -> (i32, i32) {
    %c0_i32 = arith.constant 0 : i32
    %c0_i32_0 = arith.constant 0 : i32
    return %arg0, %c0_i32 : i32, i32
  }
  func.func @transform_1(%arg0: i32) -> (i32, i32) {
    %c0_i32 = arith.constant 0 : i32
    %c0_i32_0 = arith.constant 0 : i32
    return %arg0, %c0_i32 : i32, i32
  }
  func.func @transform_2(%arg0: i32) -> (i32, i32) {
    %c0_i32 = arith.constant 0 : i32
    %c0_i32_0 = arith.constant 0 : i32
    %c0_i32_1 = arith.constant 0 : i32
    return %c0_i32, %c0_i32_0 : i32, i32
  }
  func.func @transform_3(%arg0: i32) -> (i32, i32) {
    %c0_i32 = arith.constant 0 : i32
    %c0_i32_0 = arith.constant 0 : i32
    %c0_i32_1 = arith.constant 0 : i32
    return %c0_i32, %c0_i32_0 : i32, i32
  }
  func.func @transform_4(%arg0: i32) -> (i32, i32) {
    %c0_i32 = arith.constant 0 : i32
    %c0_i32_0 = arith.constant 0 : i32
    return %arg0, %c0_i32 : i32, i32
  }
}

</mosaic_0001>

<bundles_post_ra>
// kernel: tile.9
= control target key start
LH: loop header
LB: loop body
LE: loop exit
PB: predicated region body
PF: predicated region fallthrough
CT: control target
= control target key end

     0   :  { %vm163_vm0 = vcmask 1047556   ;;  %s399_s10 = smov 96   ;;  %vm165_vm1 = vcmask 261120   ;;  %s401_s21 = smov 32   ;;  %vm202_vm2 = vcmask 1048320   ;;  %vm245_vm3 = vcmask 785920   ;;  %s580_s0 = inlined_call_operand.vmem [shape: f32[32,4,32], index: 0, kind: input, shape index: {}]   ;;  %s581_s1 = inlined_call_operand.vmem [shape: f32[32,128], index: 1, kind: output, shape index: {}]  }
   0x1   :  { %v377_v0 = vld [vmem:[%s580_s0 + $0x1c] sm:$0xf]  ;;  %v378_v1 = vld [vmem:[%s580_s0 + $0x18] sm:$0xf]  ;;  %v379_v2 = vld [vmem:[%s580_s0 + $0x14] sm:$0xf] }
   0x2   :  { %129 = vst [vmem:[#allocation0 + $0x38] sm:$0xf] %v377_v0  ;;  %134 = vst [vmem:[#allocation0 + $0x30] sm:$0xf] %v378_v1  ;;  %v380_v3 = vld [vmem:[%s580_s0 + $0x10] sm:$0xf] }
   0x3   :  { %139 = vst [vmem:[#allocation0 + $0x28] sm:$0xf] %v379_v2  ;;  %v381_v4 = vld [vmem:[%s580_s0 + $0xc] sm:$0xf]  ;;  %v382_v5 = vld [vmem:[%s580_s0 + $0x8] sm:$0xf] }
   0x4   :  { %144 = vst [vmem:[#allocation0 + $0x20] sm:$0xf] %v380_v3  ;;  %149 = vst [vmem:[#allocation0 + $0x18] sm:$0xf] %v381_v4  ;;  %v383_v6 = vld [vmem:[%s580_s0 + $0x4] sm:$0xf] }
   0x5   :  { %154 = vst [vmem:[#allocation0 + $0x10] sm:$0xf] %v382_v5  ;;  %v159_v7 = vld [vmem:[%s580_s0] sm:$0xf]  ;;  %158 = vst [vmem:[#allocation0 + $0x8] sm:$0xf] %v383_v6 }
   0x6   :  { %160 = vst [vmem:[#allocation0] sm:$0xf] %v159_v7  ;;  %v361_v8 = vld [vmem:[%s580_s0 + $0x5c] sm:$0xf]  ;;  %v362_v9 = vld [vmem:[%s580_s0 + $0x58] sm:$0xf] }
   0x7   :  { %v363_v10 = vld [vmem:[%s580_s0 + $0x54] sm:$0xf]  ;;  %49 = vst [vmem:[#allocation0 + $0xb8] sm:$0xf] %v361_v8  ;;  %54 = vst [vmem:[#allocation0 + $0xb0] sm:$0xf] %v362_v9 }
   0x8   :  { %59 = vst [vmem:[#allocation0 + $0xa8] sm:$0xf] %v363_v10  ;;  %v364_v11 = vld [vmem:[%s580_s0 + $0x50] sm:$0xf]  ;;  %v365_v12 = vld [vmem:[%s580_s0 + $0x4c] sm:$0xf] }
   0x9   :  { %v366_v13 = vld [vmem:[%s580_s0 + $0x48] sm:$0xf]  ;;  %64 = vst [vmem:[#allocation0 + $0xa0] sm:$0xf] %v364_v11  ;;  %69 = vst [vmem:[#allocation0 + $0x98] sm:$0xf] %v365_v12 }
   0xa   :  { %74 = vst [vmem:[#allocation0 + $0x90] sm:$0xf] %v366_v13  ;;  %v367_v14 = vld [vmem:[%s580_s0 + $0x44] sm:$0xf]  ;;  %v368_v15 = vld [vmem:[%s580_s0 + $0x40] sm:$0xf] }
   0xb   :  { %v369_v16 = vld [vmem:[%s580_s0 + $0x3c] sm:$0xf]  ;;  %79 = vst [vmem:[#allocation0 + $0x88] sm:$0xf] %v367_v14  ;;  %84 = vst [vmem:[#allocation0 + $0x80] sm:$0xf] %v368_v15 }
   0xc   :  { %89 = vst [vmem:[#allocation0 + $0x78] sm:$0xf] %v369_v16  ;;  %v370_v17 = vld [vmem:[%s580_s0 + $0x38] sm:$0xf]  ;;  %v371_v18 = vld [vmem:[%s580_s0 + $0x34] sm:$0xf] }
   0xd   :  { %v372_v19 = vld [vmem:[%s580_s0 + $0x30] sm:$0xf]  ;;  %94 = vst [vmem:[#allocation0 + $0x70] sm:$0xf] %v370_v17  ;;  %99 = vst [vmem:[#allocation0 + $0x68] sm:$0xf] %v371_v18 }
   0xe   :  { %104 = vst [vmem:[#allocation0 + $0x60] sm:$0xf] %v372_v19  ;;  %v373_v20 = vld [vmem:[%s580_s0 + $0x2c] sm:$0xf]  ;;  %v374_v21 = vld [vmem:[%s580_s0 + $0x28] sm:$0xf] }
   0xf   :  { %v375_v22 = vld [vmem:[%s580_s0 + $0x24] sm:$0xf]  ;;  %109 = vst [vmem:[#allocation0 + $0x58] sm:$0xf] %v373_v20  ;;  %114 = vst [vmem:[#allocation0 + $0x50] sm:$0xf] %v374_v21 }
  0x10   :  { %119 = vst [vmem:[#allocation0 + $0x48] sm:$0xf] %v375_v22  ;;  %v376_v23 = vld [vmem:[%s580_s0 + $0x20] sm:$0xf]  ;;  %v353_v24 = vld [vmem:[%s580_s0 + $0x7c] sm:$0xf] }
  0x11   :  { %v354_v25 = vld [vmem:[%s580_s0 + $0x78] sm:$0xf]  ;;  %124 = vst [vmem:[#allocation0 + $0x40] sm:$0xf] %v376_v23  ;;  %9 = vst [vmem:[#allocation0 + $0xf8] sm:$0xf] %v353_v24 }
  0x12   :  { %v197_v26 = vld [vmem:[#allocation0 + $0x3] ss:$8 sm:$0xf0]   ;;  %14 = vst [vmem:[#allocation0 + $0xf0] sm:$0xf] %v354_v25  ;;  %vm288_vm4 = vcmask 523520  }
  0x13   :  { %v355_v27 = vld [vmem:[%s580_s0 + $0x74] sm:$0xf]  ;;  %v195_v28 = vld [vmem:[#allocation0 + $0x3] ss:$8 sm:$0xf]  }
  0x14   :  { %19 = vst [vmem:[#allocation0 + $0xe8] sm:$0xf] %v355_v27  ;;  %v356_v29 = vld [vmem:[%s580_s0 + $0x70] sm:$0xf]  ;;  %v199_v30 = vsel %vm163_vm0, %v197_v26, %v195_v28  ;;  %v357_v31 = vld [vmem:[%s580_s0 + $0x6c] sm:$0xf] }
  0x15   :  { %24 = vst [vmem:[#allocation0 + $0xe0] sm:$0xf] %v356_v29  ;;  %v358_v32 = vld [vmem:[%s580_s0 + $0x68] sm:$0xf]  ;;  %v359_v33 = vld [vmem:[%s580_s0 + $0x64] sm:$0xf]  ;;  %200 = vrot.lane.b32.xlu0 %v199_v30, %s399_s10 }
  0x16   :  { %v218_v34 = vld [vmem:[#allocation0 + $0x83] ss:$8 sm:$0xf0]   ;;  %29 = vst [vmem:[#allocation0 + $0xd8] sm:$0xf] %v357_v31 }
  0x17   :  { %34 = vst [vmem:[#allocation0 + $0xd0] sm:$0xf] %v358_v32  ;;  %39 = vst [vmem:[#allocation0 + $0xc8] sm:$0xf] %v359_v33  ;;  %v360_v35 = vld [vmem:[%s580_s0 + $0x60] sm:$0xf] }
  0x18   :  { %v216_v36 = vld [vmem:[#allocation0 + $0x83] ss:$8 sm:$0xf]   ;;  %44 = vst [vmem:[#allocation0 + $0xc0] sm:$0xf] %v360_v35  ;;  %s400_s0 = smov 64  }
  0x19   :  { %v220_v37 = vsel %vm163_vm0, %v218_v34, %v216_v36  ;;  %v207_v38 = vld [vmem:[#allocation0 + $0x43] ss:$8 sm:$0xf0]   ;;  %v238_v39 = vld [vmem:[#allocation0 + $0x2] ss:$8 sm:$0xf]  }
  0x1a   :  { %221 = vrot.lane.b32.xlu1 %v220_v37, %s399_s10  ;;  %v205_v40 = vld [vmem:[#allocation0 + $0x43] ss:$8 sm:$0xf]   ;;  %v240_v41 = vld [vmem:[#allocation0 + $0x2] ss:$8 sm:$0xf0]  }
  0x1b   :  { %v209_v42 = vsel %vm163_vm0, %v207_v38, %v205_v40  ;;  %v250_v44 = vld [vmem:[#allocation0 + $0x42] ss:$8 sm:$0xf0]   ;;  %v242_v45 = vsel %vm163_vm0, %v240_v41, %v238_v39  ;;  %v281_v52 = vld [vmem:[#allocation0 + $0x1] ss:$8 sm:$0xf]  }
  0x1c   :  { %210 = vrot.lane.b32.xlu0 %v209_v42, %s399_s10  ;;  %v229_v43 = vld [vmem:[#allocation0 + $0xc3] ss:$8 sm:$0xf0]   ;;  %v248_v46 = vld [vmem:[#allocation0 + $0x42] ss:$8 sm:$0xf]  }
  0x1d   :  { %v259_v47 = vld [vmem:[#allocation0 + $0x82] ss:$8 sm:$0xf]   ;;  %v252_v53 = vsel %vm163_vm0, %v250_v44, %v248_v46  ;;  %v283_v55 = vld [vmem:[#allocation0 + $0x1] ss:$8 sm:$0xf0]  }
  0x1e   :  { %v261_v49 = vld [vmem:[#allocation0 + $0x82] ss:$8 sm:$0xf0]   ;;  %v161_v56 = vld [vmem:[#allocation0] ss:$8 sm:$0xf]   ;;  %v285_v4 = vsel %vm163_vm0, %v283_v55, %v281_v52 }
  0x1f   :  { %v227_v48 = vld [vmem:[#allocation0 + $0xc3] ss:$8 sm:$0xf]   ;;  %v272_v51 = vld [vmem:[#allocation0 + $0xc2] ss:$8 sm:$0xf0]   ;;  %v263_v54 = vsel %vm163_vm0, %v261_v49, %v259_v47 }
  0x20   :  { %v231_v50 = vsel %vm163_vm0, %v229_v43, %v227_v48  ;;  %243 = vrot.lane.b32.xlu0 %v242_v45, %s400_s0  ;;  %v270_v57 = vld [vmem:[#allocation0 + $0xc2] ss:$8 sm:$0xf]   ;;  %v162_v58 = vld [vmem:[#allocation0] ss:$8 sm:$0xf0]  }
  0x21   :  { %232 = vrot.lane.b32.xlu1 %v231_v50, %s399_s10  ;;  %v164_v59 = vsel %vm163_vm0, %v162_v58, %v161_v56  ;;  %v177_v60 = vld [vmem:[#allocation0 + $0x80] ss:$8 sm:$0xf]   ;;  %v291_v62 = vld [vmem:[#allocation0 + $0x41] ss:$8 sm:$0xf]   ;;  %v274_v3 = vsel %vm163_vm0, %v272_v51, %v270_v57 }
  0x22   :  { %v179_v61 = vld [vmem:[#allocation0 + $0x80] ss:$8 sm:$0xf0]   ;;  %v293_v63 = vld [vmem:[#allocation0 + $0x41] ss:$8 sm:$0xf0]  }
  0x23   :  { %166 = vst.msk [vmem:[%s581_s1] sm:$0xff] %vm165_vm1, %v164_v59   ;;  %v181_v0 = vsel %vm163_vm0, %v179_v61, %v177_v60  ;;  %v168_v1 = vld [vmem:[#allocation0 + $0x40] ss:$8 sm:$0xf]   ;;  %v295_v11 = vsel %vm163_vm0, %v293_v63, %v291_v62 }
  0x24   :  { %264 = vrot.lane.b32.xlu0 %v263_v54, %s400_s0  ;;  %v170_v2 = vld [vmem:[#allocation0 + $0x40] ss:$8 sm:$0xf0]   ;;  %385 = vst.msk [vmem:[%s581_s1 + $0x10] sm:$0xff] %vm165_vm1, %v181_v0  }
  0x25   :  { %253 = vrot.lane.b32.xlu1 %v252_v53, %s400_s0  ;;  %v172_v5 = vsel %vm163_vm0, %v170_v2, %v168_v1  ;;  %v186_v6 = vld [vmem:[#allocation0 + $0xc0] ss:$8 sm:$0xf]   ;;  %v302_v8 = vld [vmem:[#allocation0 + $0x81] ss:$8 sm:$0xf]  }
  0x26   :  { %v188_v7 = vld [vmem:[#allocation0 + $0xc0] ss:$8 sm:$0xf0]   ;;  %v304_v9 = vld [vmem:[#allocation0 + $0x81] ss:$8 sm:$0xf0]  }
  0x27   :  { %384 = vst.msk [vmem:[%s581_s1 + $0x8] sm:$0xff] %vm165_vm1, %v172_v5   ;;  %v190_v10 = vsel %vm163_vm0, %v188_v7, %v186_v6  ;;  %v306_v12 = vsel %vm163_vm0, %v304_v9, %v302_v8  ;;  %v313_v13 = vld [vmem:[#allocation0 + $0xc1] ss:$8 sm:$0xf]  }
  0x28   :  { %386 = vst.msk [vmem:[%s581_s1 + $0x18] sm:$0xff] %vm165_vm1, %v190_v10   ;;  %286 = vrot.lane.b32.xlu0 %v285_v4, %s401_s21  ;;  %v315_v14 = vld [vmem:[#allocation0 + $0xc1] ss:$8 sm:$0xf0]  }
  0x29   :  { %275 = vrot.lane.b32.xlu1 %v274_v3, %s400_s0  ;;  %v317_v15 = vsel %vm163_vm0, %v315_v14, %v313_v13 }
  0x2c   :  { %307 = vrot.lane.b32.xlu0 %v306_v12, %s401_s21 }
  0x2d   :  { %296 = vrot.lane.b32.xlu1 %v295_v11, %s401_s21 }
  0x31   :  { %318 = vrot.lane.b32.xlu1 %v317_v15, %s401_s21 }
  0x87   :  { %v201_v16 = vpop.permute.xlu0 %200  }
  0x88   :  { %203 = vst.msk [vmem:[%s581_s1] sm:$0xff] %vm202_vm2, %v201_v16  }
  0x8c   :  { %v222_v17 = vpop.permute.xlu1 %221  }
  0x8d   :  { %388 = vst.msk [vmem:[%s581_s1 + $0x10] sm:$0xff] %vm202_vm2, %v222_v17  }
  0x8e   :  { %v211_v18 = vpop.permute.xlu0 %210  }
  0x8f   :  { %387 = vst.msk [vmem:[%s581_s1 + $0x8] sm:$0xff] %vm202_vm2, %v211_v18  }
  0x92   :  { %v244_v20 = vpop.permute.xlu0 %243  }
  0x93   :  { %v233_v19 = vpop.permute.xlu1 %232   ;;  %246 = vst.msk [vmem:[%s581_s1] sm:$0xff] %vm245_vm3, %v244_v20  }
  0x94   :  { %389 = vst.msk [vmem:[%s581_s1 + $0x18] sm:$0xff] %vm202_vm2, %v233_v19  }
  0x96   :  { %v265_v22 = vpop.permute.xlu0 %264  }
  0x97   :  { %v254_v21 = vpop.permute.xlu1 %253   ;;  %391 = vst.msk [vmem:[%s581_s1 + $0x10] sm:$0xff] %vm245_vm3, %v265_v22  }
  0x98   :  { %390 = vst.msk [vmem:[%s581_s1 + $0x8] sm:$0xff] %vm245_vm3, %v254_v21  }
  0x9a   :  { %v287_v24 = vpop.permute.xlu0 %286  }
  0x9b   :  { %v276_v23 = vpop.permute.xlu1 %275   ;;  %289 = vst.msk [vmem:[%s581_s1] sm:$0xff] %vm288_vm4, %v287_v24  }
  0x9c   :  { %392 = vst.msk [vmem:[%s581_s1 + $0x18] sm:$0xff] %vm245_vm3, %v276_v23  }
  0x9e   :  { %v308_v26 = vpop.permute.xlu0 %307  }
  0x9f   :  { %v297_v25 = vpop.permute.xlu1 %296   ;;  %394 = vst.msk [vmem:[%s581_s1 + $0x10] sm:$0xff] %vm288_vm4, %v308_v26  }
  0xa0   :  { %393 = vst.msk [vmem:[%s581_s1 + $0x8] sm:$0xff] %vm288_vm4, %v297_v25  }
  0xa3   :  { %v319_v27 = vpop.permute.xlu1 %318  }
  0xa4   :  { %395 = vst.msk [vmem:[%s581_s1 + $0x18] sm:$0xff] %vm288_vm4, %v319_v27  }

// kernel: attention_forward.1
= control target key start
LH: loop header
LB: loop body
LE: loop exit
PB: predicated region body
PF: predicated region fallthrough
CT: control target
= control target key end

     0   :  { %v277_v0 = vmov 0.0   ;;  %vm278_vm0 = vmmov 0   ;;  %vm22_vm1 = vcmask 261120   ;;  %vm185_vm2 = vcmask 31744   ;;  %s400_s2 = inlined_call_operand.vmem [shape: f32[32,128], index: 2, kind: input, shape index: {}]   ;;  %s401_s3 = inlined_call_operand.vmem [shape: f32[128,4], index: 3, kind: input, shape index: {}]   ;;  %s402_s0 = inlined_call_operand.vmem [shape: f32[8,32], index: 0, kind: input, shape index: {}]   ;;  %s403_s1 = inlined_call_operand.vmem [shape: f32[8,128], index: 1, kind: input, shape index: {}]   ;;  %s404_s4 = inlined_call_operand.vmem [shape: f32[8,4], index: 4, kind: output, shape index: {}]  }
   0x1   :  { %225 = vmatprep.subr.mxu0 %v277_v0  ;;  %v21_v1 = vld [vmem:[%s400_s2 + $0x18] sm:$0xff]  ;;  %v20_v2 = vld [vmem:[%s400_s2 + $0x10] sm:$0xff]  ;;  %233 = vmatprep.mubr.msk.f32.mxu0 %vm278_vm0, %v277_v0  ;;  %v19_v4 = vld [vmem:[%s400_s2 + $0x8] sm:$0xff] }
   0x2   :  { %226 = vmatpush3.msra.mxu0 %v21_v1  ;;  %236 = vmatprep.subr.mxu1 %v277_v0  ;;  %v113_v3 = vld [vmem:[%s401_s3 + $0x78] sm:$0xff]  ;;  %v112_v5 = vld [vmem:[%s401_s3 + $0x70] sm:$0xff]  ;;  %v111_v6 = vld [vmem:[%s401_s3 + $0x68] sm:$0xff] }
   0x3   :  { %227 = vmatprep.subr.mxu0 %v277_v0  ;;  %237 = vmatpush3.msra.mxu1 %v113_v3  ;;  %v18_v7 = vld [vmem:[%s400_s2] sm:$0xff]  ;;  %v109_v10 = vld [vmem:[%s401_s3 + $0x58] sm:$0xff]  ;;  %v108_v11 = vld [vmem:[%s401_s3 + $0x50] sm:$0xff] }
   0x4   :  { %228 = vmatpush3.msra.mxu0 %v20_v2  ;;  %238 = vmatprep.subr.mxu1 %v277_v0  ;;  %v17_v8 = vld [vmem:[%s402_s0] sm:$0xff]  ;;  %v107_v12 = vld [vmem:[%s401_s3 + $0x48] sm:$0xff]  ;;  %v105_v14 = vld [vmem:[%s401_s3 + $0x38] sm:$0xff] }
   0x5   :  { %229 = vmatprep.subr.mxu0 %v277_v0  ;;  %239 = vmatpush3.msra.mxu1 %v112_v5  ;;  %v110_v9 = vld [vmem:[%s401_s3 + $0x60] sm:$0xff]  ;;  %v104_v15 = vld [vmem:[%s401_s3 + $0x30] sm:$0xff]  ;;  %v103_v16 = vld [vmem:[%s401_s3 + $0x28] sm:$0xff] }
   0x6   :  { %230 = vmatpush3.msra.mxu0 %v19_v4  ;;  %240 = vmatprep.subr.mxu1 %v277_v0  ;;  %v106_v13 = vld [vmem:[%s401_s3 + $0x40] sm:$0xff]  ;;  %v101_v18 = vld [vmem:[%s401_s3 + $0x18] sm:$0xff]  ;;  %v100_v19 = vld [vmem:[%s401_s3 + $0x10] sm:$0xff] }
   0x7   :  { %231 = vmatprep.subr.mxu0 %v277_v0  ;;  %241 = vmatpush3.msra.mxu1 %v111_v6  ;;  %v102_v17 = vld [vmem:[%s401_s3 + $0x20] sm:$0xff]  ;;  %v99_v20 = vld [vmem:[%s401_s3 + $0x8] sm:$0xff] }
   0x8   :  { %232 = vmatpush3.msra.mxu0 %v18_v7  ;;  %242 = vmatprep.subr.mxu1 %v277_v0  ;;  %v98_v21 = vld [vmem:[%s401_s3] sm:$0xff] }
   0x9   :  { %234 = vmatmul.mubr.msk.f32.vlgmr.msra.gmra.mxu0 %vm22_vm1, %v17_v8  ;;  %243 = vmatpush3.msra.mxu1 %v110_v9  ;;  %v96_v22 = vld [vmem:[%s403_s1] sm:$0xff] }
   0xa   :  { %244 = vmatprep.subr.mxu1 %v277_v0  ;;  %268 = vmatprep.mubr.msk.f32.mxu1 %vm278_vm0, %v277_v0 }
   0xb   :  { %245 = vmatpush3.msra.mxu1 %v109_v10 }
   0xc   :  { %246 = vmatprep.subr.mxu1 %v277_v0 }
   0xd   :  { %247 = vmatpush3.msra.mxu1 %v108_v11 }
   0xe   :  { %248 = vmatprep.subr.mxu1 %v277_v0 }
   0xf   :  { %249 = vmatpush3.msra.mxu1 %v107_v12 }
  0x10   :  { %250 = vmatprep.subr.mxu1 %v277_v0 }
  0x11   :  { %251 = vmatpush3.msra.mxu1 %v106_v13 }
  0x12   :  { %252 = vmatprep.subr.mxu1 %v277_v0 }
  0x13   :  { %253 = vmatpush3.msra.mxu1 %v105_v14 }
  0x14   :  { %254 = vmatprep.subr.mxu1 %v277_v0 }
  0x15   :  { %255 = vmatpush3.msra.mxu1 %v104_v15 }
  0x16   :  { %256 = vmatprep.subr.mxu1 %v277_v0 }
  0x17   :  { %257 = vmatpush3.msra.mxu1 %v103_v16 }
  0x18   :  { %258 = vmatprep.subr.mxu1 %v277_v0 }
  0x19   :  { %259 = vmatpush3.msra.mxu1 %v102_v17 }
  0x1a   :  { %260 = vmatprep.subr.mxu1 %v277_v0 }
  0x1b   :  { %261 = vmatpush3.msra.mxu1 %v101_v18 }
  0x1c   :  { %262 = vmatprep.subr.mxu1 %v277_v0 }
  0x1d   :  { %263 = vmatpush3.msra.mxu1 %v100_v19 }
  0x1e   :  { %264 = vmatprep.subr.mxu1 %v277_v0 }
  0x1f   :  { %265 = vmatpush3.msra.mxu1 %v99_v20 }
  0x20   :  { %266 = vmatprep.subr.mxu1 %v277_v0 }
  0x21   :  { %267 = vmatpush3.msra.mxu1 %v98_v21 }
  0xc9   :  { %v92_v23 = vpop.f32.mrf.mxu0 }
  0xca   :  { %v97_v24 = vmul.f32 %v96_v22, %v92_v23 }
  0xcb   :  { %v235_v25 = vpop.f32.mrf.mxu0 }
  0xcc   :  { %269 = vmatmul.mubr.f32.vlgmr.msra.gmra.mxu1 %v97_v24 }
 0x18c   :  { %v180_v26 = vpop.f32.mrf.mxu1 }
 0x18d   :  { %v184_v27 = vmul.f32 0.17677669, %v180_v26 }
 0x18e   :  { %v270_v28 = vpop.f32.mrf.mxu1 }
 0x18f   :  { %v186_v29 = vsel %vm185_vm2, %v184_v27, -inf }
 0x190   :  { %187 = vmax.xlane.f32.xlu0 %v186_v29 }
 0x219   :  { %v188_v30 = vpop.xlane.xlu0 %187 }
 0x21a   :  { %v189_v31 = vsub.f32 %v184_v27, %v188_v30 }
 0x21c   :  { %v190_v32 = vmul.f32 1.442695, %v189_v31 }
 0x21e   :  { %273 = vpow2.f32 %v190_v32 }
 0x22b   :  { %v274_v33 = vpop.eup %273 }
 0x22c   :  { %v192_v34 = vsel %vm185_vm2, %v274_v33, 0.0 }
 0x22d   :  { %193 = vadd.xlane.f32.xlu0 %v192_v34 }
 0x2b6   :  { %v194_v35 = vpop.xlane.xlu0 %193 }
 0x2b7   :  { %275 = vrcp.f32 %v194_v35 }
 0x2c4   :  { %v276_v36 = vpop.eup %275 }
 0x2c5   :  { %v196_v37 = vmul.f32 %v276_v36, %v274_v33 }
 0x2c7   :  { %197 = vst.msk [vmem:[%s404_s4] sm:$0xff] %vm185_vm2, %v196_v37 }

</bundles_post_ra>
